<compile_context>
chip_gen: v6e
topology: v6e:2x2x1
jax: 0.10.0
libtpu: 0.0.40
codegen_flags: <defaults>
</compile_context>

<pallas_src>
import math

import jax
import jax.numpy as jnp
from jax.experimental import pallas as pl
from jax.experimental.pallas import tpu as pltpu

HIDDEN = 32            # config.hidden_size
MID = 2 * HIDDEN       # hid_dim * 2
NUM_LABELS = 16        # config.num_labels (small example)
LN_EPS = 1e-12
TILE_ROWS = 1024       # row tile (multiple of 8); capped by padded M


def _round_up(v, m):
    return (v + m - 1) // m * m


# ------------------------------ fused kernel ------------------------------

def _answer_head_kernel(x_ref, w1_ref, vec_ref, w2_ref, o_ref):
    mid = w1_ref.shape[1]
    out_pad = o_ref.shape[1]

    x = x_ref[...]                                   # (TM, in_dim) f32
    vecs = vec_ref[...]                              # (8, vec_cols) packed slab
    b1 = vecs[0:1, :mid]
    gam = vecs[1:2, :mid]
    beta = vecs[2:3, :mid]
    b2 = vecs[3:4, :out_pad]

    # Linear 1 (MXU, f32 accumulation)
    y = jnp.dot(x, w1_ref[...], preferred_element_type=jnp.float32) + b1

    # GELU
    # TODO(synk): HF ACT2FN['gelu'] is exact erf-GELU; using the tanh
    # approximation (guaranteed Mosaic lowering), ~1e-3 deviation.
    c = math.sqrt(2.0 / math.pi)
    y2 = y * y
    g = 0.5 * y * (1.0 + jnp.tanh(c * y * (1.0 + 0.044715 * y2)))

    # LayerNorm(eps=1e-12) over mid, stats in f32
    mu = jnp.mean(g, axis=-1, keepdims=True)
    var = jnp.mean((g - mu) ** 2, axis=-1, keepdims=True)
    h = (g - mu) * jax.lax.rsqrt(var + LN_EPS) * gam + beta

    # Linear 2 (MXU, f32 accumulation) -> lane-dense (TM, out_pad) store
    out = jnp.dot(h, w2_ref[...], preferred_element_type=jnp.float32) + b2
    o_ref[...] = out.astype(o_ref.dtype)


# ------------------------------ thin wrapper ------------------------------

def answer_head(x, params, *, tile_rows=TILE_ROWS):
    """Fused Linear -> GELU -> LayerNorm -> Linear in one gridded pallas_call."""
    M, in_dim = x.shape
    w1, w2 = params['w1'], params['w2']
    mid = w1.shape[1]
    out_dim = w2.shape[1]

    # Lane-dense output slab: pad num_labels up to a multiple of 128.
    out_pad = _round_up(max(out_dim, 128), 128)
    vec_cols = max(_round_up(mid, 128), out_pad)

    # Zero-pad W2 columns; padded logit columns are exactly 0 and sliced off.
    w2p = jnp.zeros((mid, out_pad), jnp.float32).at[:, :out_dim].set(w2)

    # Pack the four small vectors into one (8, vec_cols) f32 slab (single DMA).
    vec = jnp.zeros((8, vec_cols), jnp.float32)
    vec = vec.at[0, :mid].set(params['b1'])
    vec = vec.at[1, :mid].set(params['ln_g'])
    vec = vec.at[2, :mid].set(params['ln_b'])
    vec = vec.at[3, :out_dim].set(params['b2'])

    # Row tiling: tile is a multiple of 8 sublanes, capped; pad M to whole tiles.
    tm = min(tile_rows, _round_up(M, 8))
    m_pad = _round_up(M, tm)
    xp = x if m_pad == M else jnp.pad(x, ((0, m_pad - M), (0, 0)))
    grid = (m_pad // tm,)

    flops = 2 * m_pad * in_dim * mid + 2 * m_pad * mid * out_pad + 12 * m_pad * mid
    bytes_accessed = 4 * (m_pad * in_dim + in_dim * mid + 8 * vec_cols
                          + mid * out_pad + m_pad * out_pad)

    out = pl.pallas_call(
        _answer_head_kernel,
        out_shape=jax.ShapeDtypeStruct((m_pad, out_pad), x.dtype),
        grid_spec=pltpu.PrefetchScalarGridSpec(
            num_scalar_prefetch=0,
            grid=grid,
            in_specs=[
                pl.BlockSpec((tm, in_dim), lambda i: (i, 0)),      # x stream
                pl.BlockSpec((in_dim, mid), lambda i: (0, 0)),     # W1 (resident)
                pl.BlockSpec((8, vec_cols), lambda i: (0, 0)),     # packed vectors
                pl.BlockSpec((mid, out_pad), lambda i: (0, 0)),    # W2 (resident)
            ],
            out_specs=pl.BlockSpec((tm, out_pad), lambda i: (i, 0)),
        ),
        compiler_params=pltpu.CompilerParams(
            dimension_semantics=("parallel",)),
        cost_estimate=pl.CostEstimate(flops=flops,
                                      transcendentals=m_pad * mid,
                                      bytes_accessed=bytes_accessed),
    )(xp, w1, vec, w2p)

    return out[:M, :out_dim]


def bert_visual_answer_head(params, hidden_states, name=None):
    """forward(hidden_states, name=None) of BertVisualAnswerHead."""
    if name is None or 'gqa' not in name:
        return answer_head(hidden_states, params['logit_fc'])
    return answer_head(hidden_states, params['logit_gqa'])


# ------------------------------- param init -------------------------------

def _init_head_params(key, in_dim, mid, out_dim):
    k1, k2 = jax.random.split(key, 2)
    std = 0.02
    return {
        'w1': (jax.random.normal(k1, (in_dim, mid)) * std).astype(jnp.float32),
        'b1': jnp.zeros((mid,), jnp.float32),
        'ln_g': jnp.ones((mid,), jnp.float32),
        'ln_b': jnp.zeros((mid,), jnp.float32),
        'w2': (jax.random.normal(k2, (mid, out_dim)) * std).astype(jnp.float32),
        'b2': jnp.zeros((out_dim,), jnp.float32),
    }


def init_params(key):
    k_fc, k_gqa = jax.random.split(key, 2)
    return {
        'logit_fc': _init_head_params(k_fc, HIDDEN, MID, NUM_LABELS),
        'logit_gqa': _init_head_params(k_gqa, HIDDEN, MID, NUM_LABELS),
    }


# ----------------------------------- main -----------------------------------

if __name__ == "__main__":
    B = 2

    key = jax.random.PRNGKey(0)
    k_param, k_x = jax.random.split(key, 2)

    params = init_params(k_param)
    hidden_states = jax.random.normal(k_x, (B, HIDDEN), jnp.float32)

    fwd = jax.jit(lambda p, x: bert_visual_answer_head(p, x, name=None))
    logits = fwd(params, hidden_states)
    jax.block_until_ready(logits)

    assert logits.shape == (B, NUM_LABELS)
    assert bool(jnp.all(jnp.isfinite(logits)))
    print("KERNEL_OK")
</pallas_src>

<mosaic_0001>
module attributes {stable_mosaic.version = 11 : i64} {
  func.func @_answer_head_kernel(%arg0: i32, %arg1: memref<8x32xf32, #tpu.memory_space<vmem>>, %arg2: memref<32x64xf32, #tpu.memory_space<vmem>>, %arg3: memref<8x128xf32, #tpu.memory_space<vmem>>, %arg4: memref<64x128xf32, #tpu.memory_space<vmem>>, %arg5: memref<8x128xf32, #tpu.memory_space<vmem>>) attributes {dimension_semantics = [#tpu.dimension_semantics<parallel>], iteration_bounds = array<i64: 1>, scalar_prefetch = 0 : i64, scratch_operands = 0 : i64, tpu.core_type = #tpu.core_type<tc>, window_params = [{transform_indices = @transform_0, window_bounds = array<i64: 8, 32>}, {pipeline_mode = #tpu.pipeline_mode<synchronous>, transform_indices = @transform_1, window_bounds = array<i64: 32, 64>}, {pipeline_mode = #tpu.pipeline_mode<synchronous>, transform_indices = @transform_2, window_bounds = array<i64: 8, 128>}, {pipeline_mode = #tpu.pipeline_mode<synchronous>, transform_indices = @transform_3, window_bounds = array<i64: 64, 128>}, {transform_indices = @transform_4, window_bounds = array<i64: 8, 128>}]} {
    %c0 = arith.constant 0 : index
    %c0_0 = arith.constant 0 : index
    %0 = vector.load %arg1[%c0, %c0_0] : memref<8x32xf32, #tpu.memory_space<vmem>>, vector<8x32xf32>
    %c0_1 = arith.constant 0 : index
    %c0_2 = arith.constant 0 : index
    %1 = vector.load %arg3[%c0_1, %c0_2] : memref<8x128xf32, #tpu.memory_space<vmem>>, vector<8x128xf32>
    %2 = vector.extract_strided_slice %1 {offsets = [0, 0], sizes = [1, 64], strides = [1, 1]} : vector<8x128xf32> to vector<1x64xf32>
    %3 = vector.extract_strided_slice %1 {offsets = [1, 0], sizes = [1, 64], strides = [1, 1]} : vector<8x128xf32> to vector<1x64xf32>
    %4 = vector.extract_strided_slice %1 {offsets = [2, 0], sizes = [1, 64], strides = [1, 1]} : vector<8x128xf32> to vector<1x64xf32>
    %5 = vector.extract_strided_slice %1 {offsets = [3, 0], sizes = [1, 128], strides = [1, 1]} : vector<8x128xf32> to vector<1x128xf32>
    %c0_3 = arith.constant 0 : index
    %c0_4 = arith.constant 0 : index
    %6 = vector.load %arg2[%c0_3, %c0_4] : memref<32x64xf32, #tpu.memory_space<vmem>>, vector<32x64xf32>
    %cst = arith.constant dense<0.000000e+00> : vector<8x64xf32>
    %7 = tpu.matmul %0, %6, %cst {dimension_numbers = #tpu.dot_dimension_numbers<[1], [0], [0], [1], [0, 0, 1, 1], [], []>} : vector<8x32xf32>, vector<32x64xf32>, vector<8x64xf32> -> vector<8x64xf32>
    %8 = vector.broadcast %2 : vector<1x64xf32> to vector<8x64xf32>
    %9 = arith.addf %7, %8 : vector<8x64xf32>
    %10 = arith.mulf %9, %9 : vector<8x64xf32>
    %cst_5 = arith.constant 5.000000e-01 : f32
    %11 = vector.broadcast %cst_5 : f32 to vector<8x64xf32>
    %12 = arith.mulf %11, %9 : vector<8x64xf32>
    %cst_6 = arith.constant 0.797884583 : f32
    %13 = vector.broadcast %cst_6 : f32 to vector<8x64xf32>
    %14 = arith.mulf %13, %9 : vector<8x64xf32>
    %cst_7 = arith.constant 4.471500e-02 : f32
    %15 = vector.broadcast %cst_7 : f32 to vector<8x64xf32>
    %16 = arith.mulf %15, %10 : vector<8x64xf32>
    %cst_8 = arith.constant 1.000000e+00 : f32
    %17 = vector.broadcast %cst_8 : f32 to vector<8x64xf32>
    %18 = arith.addf %17, %16 : vector<8x64xf32>
    %19 = arith.mulf %14, %18 : vector<8x64xf32>
    %20 = math.tanh %19 : vector<8x64xf32>
    %cst_9 = arith.constant 1.000000e+00 : f32
    %21 = vector.broadcast %cst_9 : f32 to vector<8x64xf32>
    %22 = arith.addf %21, %20 : vector<8x64xf32>
    %23 = arith.mulf %12, %22 : vector<8x64xf32>
    %cst_10 = arith.constant dense<0.000000e+00> : vector<8xf32>
    %24 = vector.multi_reduction <add>, %23, %cst_10 [1] : vector<8x64xf32> to vector<8xf32>
    %25 = vector.shape_cast %24 : vector<8xf32> to vector<8x1xf32>
    %cst_11 = arith.constant 6.400000e+01 : f32
    %26 = vector.broadcast %cst_11 : f32 to vector<8x1xf32>
    %27 = arith.divf %25, %26 : vector<8x1xf32>
    %28 = vector.broadcast %27 : vector<8x1xf32> to vector<8x64xf32>
    %29 = arith.subf %23, %28 : vector<8x64xf32>
    %30 = arith.mulf %29, %29 : vector<8x64xf32>
    %cst_12 = arith.constant dense<0.000000e+00> : vector<8xf32>
    %31 = vector.multi_reduction <add>, %30, %cst_12 [1] : vector<8x64xf32> to vector<8xf32>
    %32 = vector.shape_cast %31 : vector<8xf32> to vector<8x1xf32>
    %cst_13 = arith.constant 6.400000e+01 : f32
    %33 = vector.broadcast %cst_13 : f32 to vector<8x1xf32>
    %34 = arith.divf %32, %33 : vector<8x1xf32>
    %35 = vector.broadcast %27 : vector<8x1xf32> to vector<8x64xf32>
    %36 = arith.subf %23, %35 : vector<8x64xf32>
    %cst_14 = arith.constant 9.99999996E-13 : f32
    %37 = vector.broadcast %cst_14 : f32 to vector<8x1xf32>
    %38 = arith.addf %34, %37 : vector<8x1xf32>
    %39 = math.rsqrt %38 : vector<8x1xf32>
    %40 = vector.broadcast %39 : vector<8x1xf32> to vector<8x64xf32>
    %41 = arith.mulf %36, %40 : vector<8x64xf32>
    %42 = vector.broadcast %3 : vector<1x64xf32> to vector<8x64xf32>
    %43 = arith.mulf %41, %42 : vector<8x64xf32>
    %44 = vector.broadcast %4 : vector<1x64xf32> to vector<8x64xf32>
    %45 = arith.addf %43, %44 : vector<8x64xf32>
    %c0_15 = arith.constant 0 : index
    %c0_16 = arith.constant 0 : index
    %46 = vector.load %arg4[%c0_15, %c0_16] : memref<64x128xf32, #tpu.memory_space<vmem>>, vector<64x128xf32>
    %cst_17 = arith.constant dense<0.000000e+00> : vector<8x128xf32>
    %47 = tpu.matmul %45, %46, %cst_17 {dimension_numbers = #tpu.dot_dimension_numbers<[1], [0], [0], [1], [0, 0, 1, 1], [], []>} : vector<8x64xf32>, vector<64x128xf32>, vector<8x128xf32> -> vector<8x128xf32>
    %48 = vector.broadcast %5 : vector<1x128xf32> to vector<8x128xf32>
    %49 = arith.addf %47, %48 : vector<8x128xf32>
    %c0_18 = arith.constant 0 : index
    %c0_19 = arith.constant 0 : index
    %50 = vector.load %arg5[%c0_18, %c0_19] : memref<8x128xf32, #tpu.memory_space<vmem>>, vector<8x128xf32>
    tpu.vector_store %arg5[%c0_18, %c0_19], %49 {strides = array<i32>} : memref<8x128xf32, #tpu.memory_space<vmem>>, vector<8x128xf32>,
    return
  }
  func.func @transform_0(%arg0: i32) -> (i32, i32) {
    %c0_i32 = arith.constant 0 : i32
    %c0_i32_0 = arith.constant 0 : i32
    return %arg0, %c0_i32 : i32, i32
  }
  func.func @transform_1(%arg0: i32) -> (i32, i32) {
    %c0_i32 = arith.constant 0 : i32
    %c0_i32_0 = arith.constant 0 : i32
    %c0_i32_1 = arith.constant 0 : i32
    return %c0_i32, %c0_i32_0 : i32, i32
  }
  func.func @transform_2(%arg0: i32) -> (i32, i32) {
    %c0_i32 = arith.constant 0 : i32
    %c0_i32_0 = arith.constant 0 : i32
    %c0_i32_1 = arith.constant 0 : i32
    return %c0_i32, %c0_i32_0 : i32, i32
  }
  func.func @transform_3(%arg0: i32) -> (i32, i32) {
    %c0_i32 = arith.constant 0 : i32
    %c0_i32_0 = arith.constant 0 : i32
    %c0_i32_1 = arith.constant 0 : i32
    return %c0_i32, %c0_i32_0 : i32, i32
  }
  func.func @transform_4(%arg0: i32) -> (i32, i32) {
    %c0_i32 = arith.constant 0 : i32
    %c0_i32_0 = arith.constant 0 : i32
    return %arg0, %c0_i32 : i32, i32
  }
}

</mosaic_0001>

<bundles_post_ra>
// kernel: _lambda_.1
= control target key start
LH: loop header
LB: loop body
LE: loop exit
PB: predicated region body
PF: predicated region fallthrough
CT: control target
= control target key end

     0   :  { %v277_v0 = vmov 0.0   ;;  %vm278_vm0 = vmmov 0   ;;  %vm27_vm1 = vcmask 261120   ;;  %v23_v6 = vlaneseq  ;;  %s372_s1 = inlined_call_operand.vmem [shape: f32[32,64], index: 1, kind: input, shape index: {}]   ;;  %s373_s0 = inlined_call_operand.vmem [shape: f32[8,32], index: 0, kind: input, shape index: {}]   ;;  %s374_s2 = inlined_call_operand.vmem [shape: f32[8,128], index: 2, kind: input, shape index: {}]   ;;  %s375_s3 = inlined_call_operand.vmem [shape: f32[64,128], index: 3, kind: input, shape index: {}]   ;;  %s376_s4 = inlined_call_operand.vmem [shape: f32[8,128], index: 4, kind: output, shape index: {}]  }
   0x1   :  { %241 = vmatprep.subr.mxu0 %v277_v0  ;;  %v22_v1 = vld [vmem:[%s372_s1 + $0x18] sm:$0xff]  ;;  %v21_v2 = vld [vmem:[%s372_s1 + $0x10] sm:$0xff]  ;;  %249 = vmatprep.mubr.msk.f32.mxu0 %vm278_vm0, %v277_v0  ;;  %v20_v3 = vld [vmem:[%s372_s1 + $0x8] sm:$0xff]  ;;  %vm110_vm2 = vcmask 523264  }
   0x2   :  { %242 = vmatpush3.msra.mxu0 %v22_v1  ;;  %252 = vmatprep.subr.mxu1 %v277_v0  ;;  %v19_v4 = vld [vmem:[%s372_s1] sm:$0xff]  ;;  %v326_v7 = vshrl.u32 %v23_v6, 7  ;;  %v142_v29 = vld [vmem:[%s375_s3 + $0x38] sm:$0xff]  ;;  %v141_v30 = vld [vmem:[%s375_s3 + $0x30] sm:$0xff] }
   0x3   :  { %243 = vmatprep.subr.mxu0 %v277_v0  ;;  %268 = vmatprep.mubr.msk.f32.mxu1 %vm278_vm0, %v277_v0  ;;  %v17_v5 = vld [vmem:[%s373_s0] sm:$0xff]  ;;  %v140_v31 = vld [vmem:[%s375_s3 + $0x28] sm:$0xff]  ;;  %v138_v33 = vld [vmem:[%s375_s3 + $0x18] sm:$0xff] }
   0x4   :  { %244 = vmatpush3.msra.mxu0 %v21_v2  ;;  %v25_v8 = vsub.s32 0, %v326_v7  ;;  %v18_v9 = vld [vmem:[%s374_s2] sm:$0xff]  ;;  %253 = vmatpush3.msra.mxu1 %v142_v29  ;;  %v137_v34 = vld [vmem:[%s375_s3 + $0x10] sm:$0xff]  ;;  %v136_v35 = vld [vmem:[%s375_s3 + $0x8] sm:$0xff]  ;;  %v127_v40 = vsub.s32 1, %v326_v7  ;;  %v132_v41 = vsub.s32 2, %v326_v7 }
   0x5   :  { %245 = vmatprep.subr.mxu0 %v277_v0  ;;  %254 = vmatprep.subr.mxu1 %v277_v0  ;;  %v139_v32 = vld [vmem:[%s375_s3 + $0x20] sm:$0xff]  ;;  %v145_v48 = vsub.s32 3, %v326_v7 }
   0x6   :  { %246 = vmatpush3.msra.mxu0 %v20_v3  ;;  %v26_v10 = vrot.slane %v18_v9, %v25_v8  ;;  %255 = vmatpush3.msra.mxu1 %v141_v30  ;;  %v135_v36 = vld [vmem:[%s375_s3] sm:$0xff]  ;;  %v128_v42 = vrot.slane %v18_v9, %v127_v40  ;;  %v133_v45 = vrot.slane %v18_v9, %v132_v41 }
   0x7   :  { %247 = vmatprep.subr.mxu0 %v277_v0  ;;  %256 = vmatprep.subr.mxu1 %v277_v0  ;;  %v146_v49 = vrot.slane %v18_v9, %v145_v48 }
   0x8   :  { %248 = vmatpush3.msra.mxu0 %v19_v4  ;;  %257 = vmatpush3.msra.mxu1 %v140_v31 }
   0x9   :  { %250 = vmatmul.mubr.msk.f32.vlgmr.msra.gmra.mxu0 %vm27_vm1, %v17_v5  ;;  %258 = vmatprep.subr.mxu1 %v277_v0 }
   0xa   :  { %259 = vmatpush3.msra.mxu1 %v139_v32 }
   0xb   :  { %260 = vmatprep.subr.mxu1 %v277_v0 }
   0xc   :  { %261 = vmatpush3.msra.mxu1 %v138_v33 }
   0xd   :  { %262 = vmatprep.subr.mxu1 %v277_v0 }
   0xe   :  { %263 = vmatpush3.msra.mxu1 %v137_v34 }
   0xf   :  { %264 = vmatprep.subr.mxu1 %v277_v0 }
  0x10   :  { %265 = vmatpush3.msra.mxu1 %v136_v35 }
  0x11   :  { %266 = vmatprep.subr.mxu1 %v277_v0 }
  0x12   :  { %267 = vmatpush3.msra.mxu1 %v135_v36 }
  0xc9   :  { %v97_v11 = vpop.f32.mrf.mxu0 }
  0xca   :  { %v98_v12 = vadd.f32 %v97_v11, %v26_v10 }
  0xcb   :  { %v251_v13 = vpop.f32.mrf.mxu0 }
  0xcc   :  { %v101_v14 = vmul.f32 %v98_v12, %v98_v12  ;;  %v103_v16 = vmul.f32 0.7978846, %v98_v12  ;;  %v102_v20 = vmul.f32 0.5, %v98_v12 }
  0xce   :  { %v104_v15 = vmul.f32 0.044715, %v101_v14 }
  0xd0   :  { %v105_v17 = vadd.f32 1.0, %v104_v15 }
  0xd2   :  { %v106_v18 = vmul.f32 %v105_v17, %v103_v16 }
  0xd4   :  { %273 = vtanh.f32 %v106_v18 }
  0xe1   :  { %v274_v19 = vpop.eup %273 }
  0xe2   :  { %v108_v21 = vadd.f32 1.0, %v274_v19 }
  0xe4   :  { %v109_v22 = vmul.f32 %v108_v21, %v102_v20 }
  0xe6   :  { %v111_v23 = vsel %vm110_vm2, %v109_v22, 0.0 }
  0xe7   :  { %112 = vadd.xlane.f32.xlu0 %v111_v23 }
 0x170   :  { %v113_v24 = vpop.xlane.xlu0 %112 }
 0x171   :  { %v115_v25 = vmul.f32 0.015625, %v113_v24 }
 0x173   :  { %v116_v26 = vsub.f32 %v109_v22, %v115_v25 }
 0x175   :  { %v117_v27 = vmul.f32 %v116_v26, %v116_v26 }
 0x177   :  { %v118_v28 = vsel %vm110_vm2, %v117_v27, 0.0 }
 0x178   :  { %119 = vadd.xlane.f32.xlu0 %v118_v28 }
 0x201   :  { %v120_v37 = vpop.xlane.xlu0 %119 }
 0x202   :  { %v121_v38 = vmul.f32 0.015625, %v120_v37 }
 0x204   :  { %v122_v39 = vadd.f32 1e-12, %v121_v38 }
 0x206   :  { %275 = vrsqrt.f32 %v122_v39 }
 0x213   :  { %v276_v43 = vpop.eup %275 }
 0x214   :  { %v124_v44 = vmul.f32 %v276_v43, %v116_v26 }
 0x216   :  { %v129_v46 = vmul.f32 %v128_v42, %v124_v44 }
 0x218   :  { %v134_v47 = vadd.f32 %v133_v45, %v129_v46 }
 0x21a   :  { %269 = vmatmul.mubr.msk.f32.vlgmr.msra.gmra.mxu1 %vm110_vm2, %v134_v47 }
 0x2da   :  { %v216_v50 = vpop.f32.mrf.mxu1 }
 0x2db   :  { %v217_v51 = vadd.f32 %v216_v50, %v146_v49 }
 0x2dc   :  { %v270_v52 = vpop.f32.mrf.mxu1 }
 0x2dd   :  { %220 = vst [vmem:[%s376_s4] sm:$0xff] %v217_v51 }

</bundles_post_ra>
